<compile_context>
chip_gen: v7x
topology: tpu7x:2x2x1
jax: 0.10.0
libtpu: 0.0.40
codegen_flags: <defaults>
</compile_context>

<pallas_src>
import functools

import numpy as np

import jax
import jax.numpy as jnp
from jax import lax
from jax.experimental import pallas as pl
from jax.experimental.pallas import tpu as pltpu

# SimSwap's custom InstanceNorm uses eps=1e-8 (NOT torch.nn.InstanceNorm2d's 1e-5).
EPS = 1e-8


def _round_up(n, m):
    return (n + m - 1) // m * m


def _resblock_adain_kernel(H, WC, x_ref, sty_ref, m1_ref, m2_ref, g_ref,
                           o_ref, xrows_ref):
    """One grid step == one batch element.  Fully fused ResnetBlock_Adain.

    Lane layout: the last axis of every activation is (w * C + c), i.e. the
    spatial W axis and the channels are merged so all vregs are 128-lane dense.

    x_ref    : (1, H, WC)   f32   input activation (NHWC with W, C merged)
    sty_ref  : (1, 4, WC)   f32   [scale1 | shift1 | scale2 | shift2], lane-tiled,
                                  scales already include the +1
    m1_ref   : (3, WC, WC)  bf16  conv1 band matrices (one per row tap dh),
                                  W-axis reflect padding folded in
    m2_ref   : (3, WC, WC)  bf16  conv2 band matrices
    g_ref    : (WC, WC)     f32   per-channel group-mean matrix (1/(H*W) folded in)
    o_ref    : (1, H, WC)   f32   output (x + residual branch)
    xrows_ref: (H+2, WC)    f32   VMEM scratch: H-reflect-padded activation rows
    """
    g = g_ref[...]
    sty = sty_ref[0]                                  # (4, WC) f32

    def pad_rows(act):
        # ReflectionPad2d(1) along H into the VMEM scratch (W-axis reflection
        # lives in the band matrices).  The scratch stays f32 so the offset-row
        # (+1) stores/loads stay on the plain 32-bit path; the slab is only
        # (H+2)*WC*4 bytes and each row slab is cast to bf16 exactly once at
        # the matmul below (no repeated per-tap casts of the same data).
        xrows_ref[1:H + 1, :] = act
        xrows_ref[0:1, :] = act[1:2, :]
        xrows_ref[H + 1:H + 2, :] = act[H - 2:H - 1, :]

    def conv_in_style(m_ref, scale, shift, relu):
        # 3x3 conv == 3 full-lane (H, WC) x (WC, WC) bf16 MXU matmuls into one
        # f32 accumulator (one matmul per row tap; the 3 column taps + reflect
        # padding are pre-folded into each band matrix).
        # No conv bias: it is cancelled by the InstanceNorm mean subtraction.
        acc = jnp.dot(xrows_ref[0:H, :].astype(jnp.bfloat16), m_ref[0],
                      preferred_element_type=jnp.float32)
        acc = acc + jnp.dot(xrows_ref[1:H + 1, :].astype(jnp.bfloat16), m_ref[1],
                            preferred_element_type=jnp.float32)
        acc = acc + jnp.dot(xrows_ref[2:H + 2, :].astype(jnp.bfloat16), m_ref[2],
                            preferred_element_type=jnp.float32)
        # InstanceNorm statistics per channel (biased variance): reduce over H
        # with one sublane sum, then over the W lane-groups with a tiny matmul
        # against the constant group-mean matrix; results stay lane-tiled per
        # channel, so no lane<->sublane reshapes are needed.
        mean = jnp.dot(jnp.sum(acc, axis=0, keepdims=True), g,
                       preferred_element_type=jnp.float32)      # (1, WC)
        centered = acc - mean
        var = jnp.dot(jnp.sum(centered * centered, axis=0, keepdims=True), g,
                      preferred_element_type=jnp.float32)       # (1, WC)
        # Folded IN + AdaIN: a single multiply-add pass over (H, WC).
        gain = lax.rsqrt(var + EPS) * scale
        y = centered * gain + shift
        if relu:
            y = jnp.maximum(y, 0.0)
        return y                                                # (H, WC) f32

    # ---- conv1 + IN + style1 + ReLU ----
    pad_rows(x_ref[0])
    y = conv_in_style(m1_ref, sty[0:1, :], sty[1:2, :], relu=True)

    # ---- conv2 + IN + style2 (y never leaves VMEM) ----
    pad_rows(y)
    y = conv_in_style(m2_ref, sty[2:3, :], sty[3:4, :], relu=False)

    # ---- residual add + store (x re-read here, not held live across convs) ----
    o_ref[0] = x_ref[0] + y


def resnet_block_adain_forward_nhwc(x_nhwc, latent, params):
    """x_nhwc: (B, H, W, C) f32, latent: (B, L) f32 -> (B, H, W, C) f32.

    Prefer this entry point if the surrounding model is NHWC; the NCHW wrapper
    below adds two full HBM transpose passes.
    """
    B, H, W, C = x_nhwc.shape
    WC = W * C
    assert H >= 2 and W >= 2
    assert params["mconv1"].shape == (3, WC, WC), "params built for a different W"
    # This lane-dense path targets small C where W*C is lane-friendly (the test
    # config W=16, C=8 gives exactly 128 lanes).
    # TODO(synk): production dims (C=512, 28x28) need the (HW, 9C) x (9C, C)
    # im2col path with an H-tile grid axis instead of (W*C)^2 band matrices.

    # ApplyStyle: one batched (B, L) x (L, 2C) matmul per style, done in XLA.
    # Scale/shift are pre-tiled to the lane layout (lane = w*C + c) so the
    # kernel's folded IN+AdaIN affine is a single full-lane multiply-add.
    s1 = latent @ params["wsty1"] + params["bsty1"]            # (B, 2C)
    s2 = latent @ params["wsty2"] + params["bsty2"]

    def lane_tile(v):                                          # (B, C) -> (B, W*C)
        return jnp.tile(v, (1, W))

    styles = jnp.stack(
        [lane_tile(s1[:, :C] + 1.0), lane_tile(s1[:, C:]),
         lane_tile(s2[:, :C] + 1.0), lane_tile(s2[:, C:])],
        axis=1).astype(jnp.float32)                            # (B, 4, WC)

    # Per-channel group-mean matrix: (row_sums @ g)[w*C+c] = mean over (h, w) of
    # channel c, already laid out per lane (the 1/(H*W) factor is folded in).
    lane = jnp.arange(WC)
    g = jnp.where((lane[:, None] % C) == (lane[None, :] % C),
                  1.0 / (H * W), 0.0).astype(jnp.float32)      # (WC, WC)

    x_flat = x_nhwc.reshape(B, H, WC)      # free: merges the two minor dims

    kernel = functools.partial(_resblock_adain_kernel, H, WC)

    # VMEM budget derived from the actual buffers (+ headroom for compiler
    # scratch / relayout temporaries), capped below v7x's 64 MiB physical VMEM.
    f32b, bf16b = 4, 2
    buf_bytes = (
        2 * H * WC * f32b                      # x tile (double-buffered)
        + 2 * H * WC * f32b                    # out tile (double-buffered)
        + 2 * 4 * WC * f32b                    # styles (double-buffered)
        + 3 * WC * WC * bf16b                  # conv1 bands (single-buffered)
        + 3 * WC * WC * bf16b                  # conv2 bands (single-buffered)
        + WC * WC * f32b                       # group-mean matrix (single-buffered)
        + _round_up(H + 2, 8) * WC * f32b      # row-padded scratch
    )
    vmem_limit = int(min(2 * buf_bytes + 8 * (1 << 20), 48 * (1 << 20)))

    def const_spec(shape):
        # Constant blocks (index_map always zeros): single-buffered, since
        # double-buffering a grid-invariant block only wastes VMEM.
        return pl.BlockSpec(shape, lambda *_: (0,) * len(shape),
                            pipeline_mode=pl.Buffered(1))

    # TODO(synk): on v7x (2 TensorCores) add a second parallel grid axis (e.g.
    # an H tile) or guarantee B >= 2 per chip so both cores stay busy at B=1.
    out = pl.pallas_call(
        kernel,
        out_shape=jax.ShapeDtypeStruct((B, H, WC), jnp.float32),
        grid_spec=pltpu.PrefetchScalarGridSpec(
            num_scalar_prefetch=0,
            grid=(B,),
            in_specs=[
                pl.BlockSpec((1, H, WC), lambda b: (b, 0, 0)),   # x (lane-dense)
                pl.BlockSpec((1, 4, WC), lambda b: (b, 0, 0)),   # styles
                const_spec((3, WC, WC)),                         # conv1 bands (bf16)
                const_spec((3, WC, WC)),                         # conv2 bands (bf16)
                const_spec((WC, WC)),                            # group-mean (f32)
            ],
            out_specs=pl.BlockSpec((1, H, WC), lambda b: (b, 0, 0)),
            scratch_shapes=[pltpu.VMEM((H + 2, WC), jnp.float32)],
        ),
        compiler_params=pltpu.CompilerParams(
            dimension_semantics=("parallel",),
            vmem_limit_bytes=vmem_limit,
        ),
    )(x_flat, styles, params["mconv1"], params["mconv2"], g)
    return out.reshape(B, H, W, C)


def resnet_block_adain_forward(x_nchw, latent, params):
    """PyTorch-layout entry point: x (B, C, H, W)."""
    x = jnp.transpose(x_nchw, (0, 2, 3, 1))
    y = resnet_block_adain_forward_nhwc(x, latent, params)
    return jnp.transpose(y, (0, 3, 1, 2))


# ----------------------- weight conversion & init (deterministic) -----------------------
def conv3x3_to_band_matrices(w_oihw, W):
    """OIHW 3x3 conv weights -> (3, W*C, W*C) bf16 band matrices.

    m[dh, wi*C + ci, wo*C + co] accumulates tap w[co, ci, dh, dw] for every dw
    whose reflect-padded input column maps to wi, so that
        conv_out[h, wo*C + co] = sum_dh  xrows_padded[h + dh, :] @ m[dh]
    where xrows_padded carries only the H-axis reflection.
    """
    C = w_oihw.shape[0]
    taps = np.transpose(np.asarray(w_oihw, np.float32), (2, 3, 1, 0))  # (kh, kw, ci, co)
    m = np.zeros((3, W * C, W * C), np.float32)
    for wo in range(W):
        for dw in range(3):
            wi = wo + dw - 1
            if wi < 0:
                wi = 1                      # ReflectionPad2d(1), left edge
            elif wi > W - 1:
                wi = W - 2                  # right edge
            m[:, wi * C:(wi + 1) * C, wo * C:(wo + 1) * C] += taps[:, dw]
    return jnp.asarray(m, dtype=jnp.bfloat16)


def init_params(key, dim, latent_size, spatial_w):
    ks = jax.random.split(key, 8)
    # PyTorch-native shapes, then converted to the kernel layout.
    w1_oihw = 0.1 * jax.random.normal(ks[0], (dim, dim, 3, 3), jnp.float32)
    b1 = 0.1 * jax.random.normal(ks[1], (dim,), jnp.float32)
    w2_oihw = 0.1 * jax.random.normal(ks[2], (dim, dim, 3, 3), jnp.float32)
    b2 = 0.1 * jax.random.normal(ks[3], (dim,), jnp.float32)
    ws1 = 0.1 * jax.random.normal(ks[4], (2 * dim, latent_size), jnp.float32)
    bs1 = 0.1 * jax.random.normal(ks[5], (2 * dim,), jnp.float32)
    ws2 = 0.1 * jax.random.normal(ks[6], (2 * dim, latent_size), jnp.float32)
    bs2 = 0.1 * jax.random.normal(ks[7], (2 * dim,), jnp.float32)

    params = dict(
        # Conv biases are intentionally dropped: a per-channel constant is
        # exactly removed by the following no-affine InstanceNorm mean
        # subtraction (only valid while the IN stays affine-free).
        mconv1=conv3x3_to_band_matrices(w1_oihw, spatial_w),
        mconv2=conv3x3_to_band_matrices(w2_oihw, spatial_w),
        wsty1=ws1.T, bsty1=bs1,
        wsty2=ws2.T, bsty2=bs2,
    )
    torch_like = dict(w1=w1_oihw, b1=b1, w2=w2_oihw, b2=b2,
                      ws1=ws1, bs1=bs1, ws2=ws2, bs2=bs2)
    return params, torch_like


# ----------------------- pure-JAX reference (for verification) -----------------------
def reference_forward(x_nchw, latent, tp, conv_dtype=jnp.bfloat16):
    """Mirrors the PyTorch module (incl. conv bias).  `conv_dtype` sets the conv
    operand precision so it can be matched to the kernel (bf16 operands, f32
    accumulation); pass jnp.float32 for exact PyTorch numerics."""
    def conv3x3_reflect(x, w, b):
        xp = jnp.pad(x, ((0, 0), (0, 0), (1, 1), (1, 1)), mode="reflect")
        y = lax.conv_general_dilated(
            xp.astype(conv_dtype), w.astype(conv_dtype),
            window_strides=(1, 1), padding="VALID",
            dimension_numbers=("NCHW", "OIHW", "NCHW"),
            preferred_element_type=jnp.float32)
        return y + b[None, :, None, None]

    def instance_norm(x):
        x = x - jnp.mean(x, axis=(2, 3), keepdims=True)
        v = jnp.mean(x * x, axis=(2, 3), keepdims=True)
        return x * lax.rsqrt(v + EPS)

    def apply_style(x, lat, w, b):
        C = x.shape[1]
        style = lat @ w.T + b                       # (B, 2C)
        style = style.reshape(-1, 2, C, 1, 1)
        return x * (style[:, 0] + 1.0) + style[:, 1]

    y = instance_norm(conv3x3_reflect(x_nchw, tp["w1"], tp["b1"]))
    y = apply_style(y, latent, tp["ws1"], tp["bs1"])
    y = jnp.maximum(y, 0.0)
    y = instance_norm(conv3x3_reflect(y, tp["w2"], tp["b2"]))
    y = apply_style(y, latent, tp["ws2"], tp["bs2"])
    return x_nchw + y


if __name__ == "__main__":
    # Small test shape; W * C = 128 makes the merged (w, c) axis exactly one
    # full lane dimension.
    B, C, H, W = 2, 8, 16, 16
    LATENT = 16

    key = jax.random.PRNGKey(0)
    kx, kl, kp = jax.random.split(key, 3)
    x = jax.random.normal(kx, (B, C, H, W), jnp.float32)
    latent = jax.random.normal(kl, (B, LATENT), jnp.float32)
    params, torch_like = init_params(kp, C, LATENT, W)

    fwd = jax.jit(resnet_block_adain_forward)
    out = jax.block_until_ready(fwd(x, latent, params))

    # Precision-matched reference: bf16 conv operands / f32 accumulation like the
    # kernel.  Tolerance covers bf16 operand rounding, accumulation-order
    # differences, and the one extra bf16 rounding from folding the two reflected
    # boundary-column taps into a single band-matrix entry, compounded across the
    # two normalized convs.
    ref = jax.block_until_ready(reference_forward(x, latent, torch_like))
    assert out.shape == (B, C, H, W)
    max_err = float(jnp.max(jnp.abs(out - ref)))
    assert jnp.allclose(out, ref, atol=2e-2, rtol=2e-2), max_err
    print("KERNEL_OK")
</pallas_src>

<mosaic_0001>
module attributes {stable_mosaic.version = 11 : i64} {
  func.func @_resblock_adain_kernel(%arg0: i32, %arg1: memref<1x16x128xf32, #tpu.memory_space<vmem>>, %arg2: memref<1x4x128xf32, #tpu.memory_space<vmem>>, %arg3: memref<3x128x128xbf16, #tpu.memory_space<vmem>>, %arg4: memref<3x128x128xbf16, #tpu.memory_space<vmem>>, %arg5: memref<128x128xf32, #tpu.memory_space<vmem>>, %arg6: memref<1x16x128xf32, #tpu.memory_space<vmem>>, %arg7: memref<18x128xf32, #tpu.memory_space<vmem>>) attributes {dimension_semantics = [#tpu.dimension_semantics<parallel>], iteration_bounds = array<i64: 2>, scalar_prefetch = 0 : i64, scratch_operands = 1 : i64, tpu.core_type = #tpu.core_type<tc>, window_params = [{transform_indices = @transform_0, window_bounds = array<i64: 1, 16, 128>}, {transform_indices = @transform_1, window_bounds = array<i64: 1, 4, 128>}, {pipeline_mode = #tpu.pipeline_mode<synchronous>, transform_indices = @transform_2, window_bounds = array<i64: 3, 128, 128>}, {pipeline_mode = #tpu.pipeline_mode<synchronous>, transform_indices = @transform_3, window_bounds = array<i64: 3, 128, 128>}, {pipeline_mode = #tpu.pipeline_mode<synchronous>, transform_indices = @transform_4, window_bounds = array<i64: 128, 128>}, {transform_indices = @transform_5, window_bounds = array<i64: 1, 16, 128>}]} {
    %c0 = arith.constant 0 : index
    %c0_0 = arith.constant 0 : index
    %0 = vector.load %arg5[%c0, %c0_0] : memref<128x128xf32, #tpu.memory_space<vmem>>, vector<128x128xf32>
    %c0_1 = arith.constant 0 : index
    %c0_2 = arith.constant 0 : index
    %c0_3 = arith.constant 0 : index
    %1 = vector.load %arg2[%c0_1, %c0_2, %c0_3] : memref<1x4x128xf32, #tpu.memory_space<vmem>>, vector<1x4x128xf32>
    %2 = vector.shape_cast %1 : vector<1x4x128xf32> to vector<4x128xf32>
    %c0_4 = arith.constant 0 : index
    %c0_5 = arith.constant 0 : index
    %c0_6 = arith.constant 0 : index
    %3 = vector.load %arg1[%c0_4, %c0_5, %c0_6] : memref<1x16x128xf32, #tpu.memory_space<vmem>>, vector<1x16x128xf32>
    %4 = vector.shape_cast %3 : vector<1x16x128xf32> to vector<16x128xf32>
    %c1 = arith.constant 1 : index
    %c0_7 = arith.constant 0 : index
    %5 = vector.load %arg7[%c1, %c0_7] : memref<18x128xf32, #tpu.memory_space<vmem>>, vector<16x128xf32>
    tpu.vector_store %arg7[%c1, %c0_7], %4 {strides = array<i32>} : memref<18x128xf32, #tpu.memory_space<vmem>>, vector<16x128xf32>,
    %6 = vector.extract_strided_slice %4 {offsets = [1, 0], sizes = [1, 128], strides = [1, 1]} : vector<16x128xf32> to vector<1x128xf32>
    %c0_8 = arith.constant 0 : index
    %c0_9 = arith.constant 0 : index
    %7 = vector.load %arg7[%c0_8, %c0_9] : memref<18x128xf32, #tpu.memory_space<vmem>>, vector<1x128xf32>
    tpu.vector_store %arg7[%c0_8, %c0_9], %6 {strides = array<i32>} : memref<18x128xf32, #tpu.memory_space<vmem>>, vector<1x128xf32>,
    %8 = vector.extract_strided_slice %4 {offsets = [14, 0], sizes = [1, 128], strides = [1, 1]} : vector<16x128xf32> to vector<1x128xf32>
    %c17 = arith.constant 17 : index
    %c0_10 = arith.constant 0 : index
    %9 = vector.load %arg7[%c17, %c0_10] : memref<18x128xf32, #tpu.memory_space<vmem>>, vector<1x128xf32>
    tpu.vector_store %arg7[%c17, %c0_10], %8 {strides = array<i32>} : memref<18x128xf32, #tpu.memory_space<vmem>>, vector<1x128xf32>,
    %10 = vector.extract_strided_slice %2 {offsets = [0, 0], sizes = [1, 128], strides = [1, 1]} : vector<4x128xf32> to vector<1x128xf32>
    %11 = vector.extract_strided_slice %2 {offsets = [1, 0], sizes = [1, 128], strides = [1, 1]} : vector<4x128xf32> to vector<1x128xf32>
    %c0_11 = arith.constant 0 : index
    %c0_12 = arith.constant 0 : index
    %12 = vector.load %arg7[%c0_11, %c0_12] : memref<18x128xf32, #tpu.memory_space<vmem>>, vector<16x128xf32>
    %13 = arith.truncf %12 : vector<16x128xf32> to vector<16x128xbf16>
    %c0_13 = arith.constant 0 : index
    %c0_14 = arith.constant 0 : index
    %c0_15 = arith.constant 0 : index
    %14 = vector.load %arg3[%c0_13, %c0_14, %c0_15] : memref<3x128x128xbf16, #tpu.memory_space<vmem>>, vector<1x128x128xbf16>
    %15 = vector.shape_cast %14 : vector<1x128x128xbf16> to vector<128x128xbf16>
    %cst = arith.constant dense<0.000000e+00> : vector<16x128xf32>
    %16 = tpu.matmul %13, %15, %cst {dimension_numbers = #tpu.dot_dimension_numbers<[1], [0], [0], [1], [0, 0, 1, 1], [], []>} : vector<16x128xbf16>, vector<128x128xbf16>, vector<16x128xf32> -> vector<16x128xf32>
    %c1_16 = arith.constant 1 : index
    %c0_17 = arith.constant 0 : index
    %17 = vector.load %arg7[%c1_16, %c0_17] : memref<18x128xf32, #tpu.memory_space<vmem>>, vector<16x128xf32>
    %18 = arith.truncf %17 : vector<16x128xf32> to vector<16x128xbf16>
    %c1_18 = arith.constant 1 : index
    %c0_19 = arith.constant 0 : index
    %c0_20 = arith.constant 0 : index
    %19 = vector.load %arg3[%c1_18, %c0_19, %c0_20] : memref<3x128x128xbf16, #tpu.memory_space<vmem>>, vector<1x128x128xbf16>
    %20 = vector.shape_cast %19 : vector<1x128x128xbf16> to vector<128x128xbf16>
    %cst_21 = arith.constant dense<0.000000e+00> : vector<16x128xf32>
    %21 = tpu.matmul %18, %20, %cst_21 {dimension_numbers = #tpu.dot_dimension_numbers<[1], [0], [0], [1], [0, 0, 1, 1], [], []>} : vector<16x128xbf16>, vector<128x128xbf16>, vector<16x128xf32> -> vector<16x128xf32>
    %22 = arith.addf %16, %21 : vector<16x128xf32>
    %c2 = arith.constant 2 : index
    %c0_22 = arith.constant 0 : index
    %23 = vector.load %arg7[%c2, %c0_22] : memref<18x128xf32, #tpu.memory_space<vmem>>, vector<16x128xf32>
    %24 = arith.truncf %23 : vector<16x128xf32> to vector<16x128xbf16>
    %c2_23 = arith.constant 2 : index
    %c0_24 = arith.constant 0 : index
    %c0_25 = arith.constant 0 : index
    %25 = vector.load %arg3[%c2_23, %c0_24, %c0_25] : memref<3x128x128xbf16, #tpu.memory_space<vmem>>, vector<1x128x128xbf16>
    %26 = vector.shape_cast %25 : vector<1x128x128xbf16> to vector<128x128xbf16>
    %cst_26 = arith.constant dense<0.000000e+00> : vector<16x128xf32>
    %27 = tpu.matmul %24, %26, %cst_26 {dimension_numbers = #tpu.dot_dimension_numbers<[1], [0], [0], [1], [0, 0, 1, 1], [], []>} : vector<16x128xbf16>, vector<128x128xbf16>, vector<16x128xf32> -> vector<16x128xf32>
    %28 = arith.addf %22, %27 : vector<16x128xf32>
    %cst_27 = arith.constant dense<0.000000e+00> : vector<128xf32>
    %29 = vector.multi_reduction <add>, %28, %cst_27 [0] : vector<16x128xf32> to vector<128xf32>
    %30 = vector.shape_cast %29 : vector<128xf32> to vector<1x128xf32>
    %cst_28 = arith.constant dense<0.000000e+00> : vector<1x128xf32>
    %31 = tpu.matmul %30, %0, %cst_28 {dimension_numbers = #tpu.dot_dimension_numbers<[1], [0], [0], [1], [0, 0, 1, 1], [], []>} : vector<1x128xf32>, vector<128x128xf32>, vector<1x128xf32> -> vector<1x128xf32>
    %32 = vector.broadcast %31 : vector<1x128xf32> to vector<16x128xf32>
    %33 = arith.subf %28, %32 : vector<16x128xf32>
    %34 = arith.mulf %33, %33 : vector<16x128xf32>
    %cst_29 = arith.constant dense<0.000000e+00> : vector<128xf32>
    %35 = vector.multi_reduction <add>, %34, %cst_29 [0] : vector<16x128xf32> to vector<128xf32>
    %36 = vector.shape_cast %35 : vector<128xf32> to vector<1x128xf32>
    %cst_30 = arith.constant dense<0.000000e+00> : vector<1x128xf32>
    %37 = tpu.matmul %36, %0, %cst_30 {dimension_numbers = #tpu.dot_dimension_numbers<[1], [0], [0], [1], [0, 0, 1, 1], [], []>} : vector<1x128xf32>, vector<128x128xf32>, vector<1x128xf32> -> vector<1x128xf32>
    %cst_31 = arith.constant 9.99999993E-9 : f32
    %38 = vector.broadcast %cst_31 : f32 to vector<1x128xf32>
    %39 = arith.addf %37, %38 : vector<1x128xf32>
    %40 = math.rsqrt %39 : vector<1x128xf32>
    %41 = arith.mulf %40, %10 : vector<1x128xf32>
    %42 = vector.broadcast %41 : vector<1x128xf32> to vector<16x128xf32>
    %43 = arith.mulf %33, %42 : vector<16x128xf32>
    %44 = vector.broadcast %11 : vector<1x128xf32> to vector<16x128xf32>
    %45 = arith.addf %43, %44 : vector<16x128xf32>
    %cst_32 = arith.constant 0.000000e+00 : f32
    %46 = vector.broadcast %cst_32 : f32 to vector<16x128xf32>
    %47 = arith.maximumf %45, %46 : vector<16x128xf32>
    %c1_33 = arith.constant 1 : index
    %c0_34 = arith.constant 0 : index
    %48 = vector.load %arg7[%c1_33, %c0_34] : memref<18x128xf32, #tpu.memory_space<vmem>>, vector<16x128xf32>
    tpu.vector_store %arg7[%c1_33, %c0_34], %47 {strides = array<i32>} : memref<18x128xf32, #tpu.memory_space<vmem>>, vector<16x128xf32>,
    %49 = vector.extract_strided_slice %47 {offsets = [1, 0], sizes = [1, 128], strides = [1, 1]} : vector<16x128xf32> to vector<1x128xf32>
    %c0_35 = arith.constant 0 : index
    %c0_36 = arith.constant 0 : index
    %50 = vector.load %arg7[%c0_35, %c0_36] : memref<18x128xf32, #tpu.memory_space<vmem>>, vector<1x128xf32>
    tpu.vector_store %arg7[%c0_35, %c0_36], %49 {strides = array<i32>} : memref<18x128xf32, #tpu.memory_space<vmem>>, vector<1x128xf32>,
    %51 = vector.extract_strided_slice %47 {offsets = [14, 0], sizes = [1, 128], strides = [1, 1]} : vector<16x128xf32> to vector<1x128xf32>
    %c17_37 = arith.constant 17 : index
    %c0_38 = arith.constant 0 : index
    %52 = vector.load %arg7[%c17_37, %c0_38] : memref<18x128xf32, #tpu.memory_space<vmem>>, vector<1x128xf32>
    tpu.vector_store %arg7[%c17_37, %c0_38], %51 {strides = array<i32>} : memref<18x128xf32, #tpu.memory_space<vmem>>, vector<1x128xf32>,
    %53 = vector.extract_strided_slice %2 {offsets = [2, 0], sizes = [1, 128], strides = [1, 1]} : vector<4x128xf32> to vector<1x128xf32>
    %54 = vector.extract_strided_slice %2 {offsets = [3, 0], sizes = [1, 128], strides = [1, 1]} : vector<4x128xf32> to vector<1x128xf32>
    %c0_39 = arith.constant 0 : index
    %c0_40 = arith.constant 0 : index
    %55 = vector.load %arg7[%c0_39, %c0_40] : memref<18x128xf32, #tpu.memory_space<vmem>>, vector<16x128xf32>
    %56 = arith.truncf %55 : vector<16x128xf32> to vector<16x128xbf16>
    %c0_41 = arith.constant 0 : index
    %c0_42 = arith.constant 0 : index
    %c0_43 = arith.constant 0 : index
    %57 = vector.load %arg4[%c0_41, %c0_42, %c0_43] : memref<3x128x128xbf16, #tpu.memory_space<vmem>>, vector<1x128x128xbf16>
    %58 = vector.shape_cast %57 : vector<1x128x128xbf16> to vector<128x128xbf16>
    %cst_44 = arith.constant dense<0.000000e+00> : vector<16x128xf32>
    %59 = tpu.matmul %56, %58, %cst_44 {dimension_numbers = #tpu.dot_dimension_numbers<[1], [0], [0], [1], [0, 0, 1, 1], [], []>} : vector<16x128xbf16>, vector<128x128xbf16>, vector<16x128xf32> -> vector<16x128xf32>
    %c1_45 = arith.constant 1 : index
    %c0_46 = arith.constant 0 : index
    %60 = vector.load %arg7[%c1_45, %c0_46] : memref<18x128xf32, #tpu.memory_space<vmem>>, vector<16x128xf32>
    %61 = arith.truncf %60 : vector<16x128xf32> to vector<16x128xbf16>
    %c1_47 = arith.constant 1 : index
    %c0_48 = arith.constant 0 : index
    %c0_49 = arith.constant 0 : index
    %62 = vector.load %arg4[%c1_47, %c0_48, %c0_49] : memref<3x128x128xbf16, #tpu.memory_space<vmem>>, vector<1x128x128xbf16>
    %63 = vector.shape_cast %62 : vector<1x128x128xbf16> to vector<128x128xbf16>
    %cst_50 = arith.constant dense<0.000000e+00> : vector<16x128xf32>
    %64 = tpu.matmul %61, %63, %cst_50 {dimension_numbers = #tpu.dot_dimension_numbers<[1], [0], [0], [1], [0, 0, 1, 1], [], []>} : vector<16x128xbf16>, vector<128x128xbf16>, vector<16x128xf32> -> vector<16x128xf32>
    %65 = arith.addf %59, %64 : vector<16x128xf32>
    %c2_51 = arith.constant 2 : index
    %c0_52 = arith.constant 0 : index
    %66 = vector.load %arg7[%c2_51, %c0_52] : memref<18x128xf32, #tpu.memory_space<vmem>>, vector<16x128xf32>
    %67 = arith.truncf %66 : vector<16x128xf32> to vector<16x128xbf16>
    %c2_53 = arith.constant 2 : index
    %c0_54 = arith.constant 0 : index
    %c0_55 = arith.constant 0 : index
    %68 = vector.load %arg4[%c2_53, %c0_54, %c0_55] : memref<3x128x128xbf16, #tpu.memory_space<vmem>>, vector<1x128x128xbf16>
    %69 = vector.shape_cast %68 : vector<1x128x128xbf16> to vector<128x128xbf16>
    %cst_56 = arith.constant dense<0.000000e+00> : vector<16x128xf32>
    %70 = tpu.matmul %67, %69, %cst_56 {dimension_numbers = #tpu.dot_dimension_numbers<[1], [0], [0], [1], [0, 0, 1, 1], [], []>} : vector<16x128xbf16>, vector<128x128xbf16>, vector<16x128xf32> -> vector<16x128xf32>
    %71 = arith.addf %65, %70 : vector<16x128xf32>
    %cst_57 = arith.constant dense<0.000000e+00> : vector<128xf32>
    %72 = vector.multi_reduction <add>, %71, %cst_57 [0] : vector<16x128xf32> to vector<128xf32>
    %73 = vector.shape_cast %72 : vector<128xf32> to vector<1x128xf32>
    %cst_58 = arith.constant dense<0.000000e+00> : vector<1x128xf32>
    %74 = tpu.matmul %73, %0, %cst_58 {dimension_numbers = #tpu.dot_dimension_numbers<[1], [0], [0], [1], [0, 0, 1, 1], [], []>} : vector<1x128xf32>, vector<128x128xf32>, vector<1x128xf32> -> vector<1x128xf32>
    %75 = vector.broadcast %74 : vector<1x128xf32> to vector<16x128xf32>
    %76 = arith.subf %71, %75 : vector<16x128xf32>
    %77 = arith.mulf %76, %76 : vector<16x128xf32>
    %cst_59 = arith.constant dense<0.000000e+00> : vector<128xf32>
    %78 = vector.multi_reduction <add>, %77, %cst_59 [0] : vector<16x128xf32> to vector<128xf32>
    %79 = vector.shape_cast %78 : vector<128xf32> to vector<1x128xf32>
    %cst_60 = arith.constant dense<0.000000e+00> : vector<1x128xf32>
    %80 = tpu.matmul %79, %0, %cst_60 {dimension_numbers = #tpu.dot_dimension_numbers<[1], [0], [0], [1], [0, 0, 1, 1], [], []>} : vector<1x128xf32>, vector<128x128xf32>, vector<1x128xf32> -> vector<1x128xf32>
    %cst_61 = arith.constant 9.99999993E-9 : f32
    %81 = vector.broadcast %cst_61 : f32 to vector<1x128xf32>
    %82 = arith.addf %80, %81 : vector<1x128xf32>
    %83 = math.rsqrt %82 : vector<1x128xf32>
    %84 = arith.mulf %83, %53 : vector<1x128xf32>
    %85 = vector.broadcast %84 : vector<1x128xf32> to vector<16x128xf32>
    %86 = arith.mulf %76, %85 : vector<16x128xf32>
    %87 = vector.broadcast %54 : vector<1x128xf32> to vector<16x128xf32>
    %88 = arith.addf %86, %87 : vector<16x128xf32>
    %c0_62 = arith.constant 0 : index
    %c0_63 = arith.constant 0 : index
    %c0_64 = arith.constant 0 : index
    %89 = vector.load %arg1[%c0_62, %c0_63, %c0_64] : memref<1x16x128xf32, #tpu.memory_space<vmem>>, vector<1x16x128xf32>
    %90 = vector.shape_cast %89 : vector<1x16x128xf32> to vector<16x128xf32>
    %91 = arith.addf %90, %88 : vector<16x128xf32>
    %c0_65 = arith.constant 0 : index
    %c0_66 = arith.constant 0 : index
    %c0_67 = arith.constant 0 : index
    %92 = vector.load %arg6[%c0_65, %c0_66, %c0_67] : memref<1x16x128xf32, #tpu.memory_space<vmem>>, vector<1x16x128xf32>
    %93 = vector.shape_cast %92 : vector<1x16x128xf32> to vector<16x128xf32>
    %94 = vector.shape_cast %91 : vector<16x128xf32> to vector<1x16x128xf32>
    tpu.vector_store %arg6[%c0_65, %c0_66, %c0_67], %94 {strides = array<i32>} : memref<1x16x128xf32, #tpu.memory_space<vmem>>, vector<1x16x128xf32>,
    return
  }
  func.func @transform_0(%arg0: i32) -> (i32, i32, i32) {
    %c0_i32 = arith.constant 0 : i32
    %c0_i32_0 = arith.constant 0 : i32
    %c0_i32_1 = arith.constant 0 : i32
    return %arg0, %c0_i32, %c0_i32_0 : i32, i32, i32
  }
  func.func @transform_1(%arg0: i32) -> (i32, i32, i32) {
    %c0_i32 = arith.constant 0 : i32
    %c0_i32_0 = arith.constant 0 : i32
    %c0_i32_1 = arith.constant 0 : i32
    return %arg0, %c0_i32, %c0_i32_0 : i32, i32, i32
  }
  func.func @transform_2(%arg0: i32) -> (i32, i32, i32) {
    %c0_i32 = arith.constant 0 : i32
    %c0_i32_0 = arith.constant 0 : i32
    %c0_i32_1 = arith.constant 0 : i32
    %c0_i32_2 = arith.constant 0 : i32
    return %c0_i32, %c0_i32_0, %c0_i32_1 : i32, i32, i32
  }
  func.func @transform_3(%arg0: i32) -> (i32, i32, i32) {
    %c0_i32 = arith.constant 0 : i32
    %c0_i32_0 = arith.constant 0 : i32
    %c0_i32_1 = arith.constant 0 : i32
    %c0_i32_2 = arith.constant 0 : i32
    return %c0_i32, %c0_i32_0, %c0_i32_1 : i32, i32, i32
  }
  func.func @transform_4(%arg0: i32) -> (i32, i32) {
    %c0_i32 = arith.constant 0 : i32
    %c0_i32_0 = arith.constant 0 : i32
    %c0_i32_1 = arith.constant 0 : i32
    return %c0_i32, %c0_i32_0 : i32, i32
  }
  func.func @transform_5(%arg0: i32) -> (i32, i32, i32) {
    %c0_i32 = arith.constant 0 : i32
    %c0_i32_0 = arith.constant 0 : i32
    %c0_i32_1 = arith.constant 0 : i32
    return %arg0, %c0_i32, %c0_i32_0 : i32, i32, i32
  }
}

</mosaic_0001>

<bundles_post_ra>
// kernel: resnet_block_adain_forward.1
= control target key start
LH: loop header
LB: loop body
LE: loop exit
PB: predicated region body
PF: predicated region fallthrough
CT: control target
= control target key end

     0   :  { %s2080_s18 = smov 0   ;;  %s2477_s0 = inlined_call_operand.vmem [shape: f32[2,16,128], index: 0, kind: input, shape index: {}]   ;;  %s2478_s1 = inlined_call_operand.vmem [shape: f32[2,4,128], index: 1, kind: input, shape index: {}]   ;;  %s2479_s2 = inlined_call_operand.vmem [shape: bf16[3,128,128], index: 2, kind: input, shape index: {}]   ;;  %s2480_s3 = inlined_call_operand.vmem [shape: bf16[3,128,128], index: 3, kind: input, shape index: {}]   ;;  %s2481_s4 = inlined_call_operand.vmem [shape: f32[128,128], index: 4, kind: input, shape index: {}]   ;;  %s2482_s5 = inlined_call_operand.vmem [shape: f32[2,16,128], index: 5, kind: output, shape index: {}]  }
   0x1 LB: > { %s1356_s19 = sadd.s32 4294967295, %s2045_s18   ;;  %p1360_p0 = scmp.ge.s32.totalorder %s2045_s18, 1  ;;  %s2045_s18 = sphi %s2080_s18, %s15_s18  }
   0x2   : > { %p196_p1 = scmp.lt.s32.totalorder %s2045_s18, 3 }
   0x4   : > { %p197_p2 = pnand %p1360_p0, %p196_p1 }
   0x5   : > { %v1987_v0 = vld [vmem:[%s2479_s2 + $0x40] sm:$0xff] (!%p197_p2)   ;;  %v2047_v1 = vmov (!%p197_p2), 0.0   ;;  %v1988_v2 = vld [vmem:[%s2479_s2 + $0x48] sm:$0xff] (!%p197_p2)   ;;  %vm2048_vm0 = vmmov (!%p197_p2), 0   ;;  %p228_p3 = scmp.lt.s32.totalorder (!%p197_p2), %s1356_s19, 1  ;;  %v2049_v3 = vmov (!%p197_p2), 0.0|0.0  }
   0x6   : > { %200 = sbr.rel (%p197_p2) target bundleno = 1559 (0x617), region = 40  ;;  %1604 = vmatprep.subr.bf16.mxu0 (!%p197_p2), %v2047_v1  ;;  %1620 = vmatprep.mubr.msk.bf16.mxu0 (!%p197_p2), %vm2048_vm0, %v2047_v1  ;;  %v1989_v4 = vld [vmem:[%s2479_s2 + $0x50] sm:$0xff] (!%p197_p2)   ;;  %v1990_v7 = vld [vmem:[%s2479_s2 + $0x58] sm:$0xff] (!%p197_p2)   ;;  %v1991_v8 = vld [vmem:[%s2479_s2 + $0x60] sm:$0xff] (!%p197_p2)  }
   0x7   : > { %1605 = vmatpush3.bf16.msra.mxu0 (!%p197_p2), %v1987_v0  ;;  %1696 = vmatprep.mubr.msk.f32.mxu1 (!%p197_p2), %vm2048_vm0, %v2047_v1  ;;  %v1992_v9 = vld [vmem:[%s2479_s2 + $0x68] sm:$0xff] (!%p197_p2)   ;;  %v1993_v10 = vld [vmem:[%s2479_s2 + $0x70] sm:$0xff] (!%p197_p2)   ;;  %v1994_v11 = vld [vmem:[%s2479_s2 + $0x78] sm:$0xff] (!%p197_p2)  }
   0x8   : > { %1606 = vmatprep.subr.bf16.mxu0 (!%p197_p2), %v2047_v1  ;;  %1864 = vmatprep.subr.bf16.mxu1 (!%p197_p2), %v2049_v3  ;;  %v243_v12 = vld [vmem:[%s2481_s4] sm:$0xff] (!%p197_p2)  ;;  %v244_v13 = vld [vmem:[%s2481_s4 + $0x8] sm:$0xff] (!%p197_p2)  ;;  %v245_v14 = vld [vmem:[%s2481_s4 + $0x10] sm:$0xff] (!%p197_p2) }
   0x9   : > { %v2150_v15 = vpack.c.bf16 (!%p197_p2), %v244_v13, %v243_v12  ;;  %v246_v16 = vld [vmem:[%s2481_s4 + $0x18] sm:$0xff] (!%p197_p2)  ;;  %v1995_v17 = vld [vmem:[%s2479_s2] sm:$0xff] (!%p197_p2)   ;;  %v248_v19 = vld [vmem:[%s2481_s4 + $0x28] sm:$0xff] (!%p197_p2) }
   0xa   : > { %v247_v18 = vld [vmem:[%s2481_s4 + $0x20] sm:$0xff] (!%p197_p2)  ;;  %v2167_v21 = vpack.c.bf16 (!%p197_p2), %v246_v16, %v245_v14  ;;  %v1996_v22 = vld [vmem:[%s2479_s2 + $0x8] sm:$0xff] (!%p197_p2)   ;;  %v249_v23 = vld [vmem:[%s2481_s4 + $0x30] sm:$0xff] (!%p197_p2) }
   0xb   : > { %1607 = vmatpush3.bf16.msra.mxu0 (!%p197_p2), %v1988_v2  ;;  %1866 = vmatpush3.bf16.msra.mxu1 (!%p197_p2), %v2150_v15  ;;  %v250_v24 = vld [vmem:[%s2481_s4 + $0x38] sm:$0xff] (!%p197_p2)  ;;  %v2181_v25 = vpack.c.bf16 (!%p197_p2), %v248_v19, %v247_v18  ;;  %v1997_v26 = vld [vmem:[%s2479_s2 + $0x10] sm:$0xff] (!%p197_p2)   ;;  %v1999_v29 = vld [vmem:[%s2479_s2 + $0x20] sm:$0xff] (!%p197_p2)  }
   0xc   : > { %1608 = vmatprep.subr.bf16.mxu0 (!%p197_p2), %v2047_v1  ;;  %1867 = vmatprep.subr.bf16.mxu1 (!%p197_p2), %v2049_v3  ;;  %v2191_v27 = vpack.c.bf16 (!%p197_p2), %v250_v24, %v249_v23  ;;  %v1998_v28 = vld [vmem:[%s2479_s2 + $0x18] sm:$0xff] (!%p197_p2)   ;;  %v2000_v30 = vld [vmem:[%s2479_s2 + $0x28] sm:$0xff] (!%p197_p2)   ;;  %v2001_v31 = vld [vmem:[%s2479_s2 + $0x30] sm:$0xff] (!%p197_p2)  }
   0xd   : > { %s2484_s19 = smov (!%p228_p3, %s1356_s19), 1  ;;  %v2002_v32 = vld [vmem:[%s2479_s2 + $0x38] sm:$0xff]   ;;  %v2003_v36 = vld [vmem:[%s2479_s2 + $0x80] sm:$0xff]   ;;  %v2004_v37 = vld [vmem:[%s2479_s2 + $0x88] sm:$0xff]  }
   0xe   : > { %s1480_s26 = sshll.u32 %s2484_s19, 4  ;;  %v2005_v38 = vld [vmem:[%s2479_s2 + $0x90] sm:$0xff]   ;;  %v2006_v39 = vld [vmem:[%s2479_s2 + $0x98] sm:$0xff]   ;;  %v2007_v40 = vld [vmem:[%s2479_s2 + $0xa0] sm:$0xff]   ;;  %s1363_s7 = sshll.u32 %s2484_s19, 2 }
   0xf   : > { %s232_s29 = scalar_lea.vmem %s2477_s0, %s1480_s26  ;;  %1609 = vmatpush3.bf16.msra.mxu0 %v1989_v4  ;;  %1869 = vmatpush3.bf16.msra.mxu1 %v2167_v21  ;;  %v2008_v41 = vld [vmem:[%s2479_s2 + $0xa8] sm:$0xff]   ;;  %v2009_v42 = vld [vmem:[%s2479_s2 + $0xb0] sm:$0xff]   ;;  %v2010_v43 = vld [vmem:[%s2479_s2 + $0xb8] sm:$0xff]   ;;  %s236_s10 = scalar_lea.vmem %s2478_s1, %s1363_s7 }
  0x10   : > { %v2113_v5 = vld [vmem:[%s232_s29] sm:$0xff]  ;;  %v2115_v6 = vld [vmem:[%s232_s29 + $0x8] sm:$0xff]  ;;  %1610 = vmatprep.subr.bf16.mxu0 %v2047_v1  ;;  %1870 = vmatprep.subr.bf16.mxu1 %v2049_v3  ;;  %v253_v50 = vld [vmem:[%s2481_s4 + $0x50] sm:$0xff]  ;;  %s241_s25 = scalar_lea.vmem %s2482_s5, %s1480_s26 }
  0x11   : > { %262 = vst [vmem:[#allocation2 + $0x1] sm:$0xff] %v2113_v5  ;;  %263 = vst [vmem:[#allocation2 + $0x9] sm:$0xff] %v2115_v6  ;;  %v287_v20 = vpack.c.bf16 %v2115_v6, %v2113_v5  ;;  %v251_v47 = vld [vmem:[%s2481_s4 + $0x40] sm:$0xff]  ;;  %v252_v48 = vld [vmem:[%s2481_s4 + $0x48] sm:$0xff] }
  0x12   : > { %264 = vst [vmem:[#allocation2 - $0x1] sm:$0x2] %v2113_v5  ;;  %265 = vst [vmem:[#allocation2 + $0xb] sm:$0x40] %v2115_v6  ;;  %v2268_v49 = vpack.c.bf16 %v252_v48, %v251_v47  ;;  %v254_v51 = vld [vmem:[%s2481_s4 + $0x58] sm:$0xff]  ;;  %v255_v53 = vld [vmem:[%s2481_s4 + $0x60] sm:$0xff] }
  0x13   : > { %1611 = vmatpush3.bf16.msra.mxu0 %v1990_v7  ;;  %1872 = vmatpush3.bf16.msra.mxu1 %v2181_v25  ;;  %v2280_v52 = vpack.c.bf16 %v254_v51, %v253_v50  ;;  %v256_v54 = vld [vmem:[%s2481_s4 + $0x68] sm:$0xff]  ;;  %v257_v56 = vld [vmem:[%s2481_s4 + $0x70] sm:$0xff]  ;;  %v258_v57 = vld [vmem:[%s2481_s4 + $0x78] sm:$0xff] }
  0x14   : > { %1612 = vmatprep.subr.bf16.mxu0 %v2047_v1  ;;  %1873 = vmatprep.subr.bf16.mxu1 %v2049_v3  ;;  %v2292_v55 = vpack.c.bf16 %v256_v54, %v255_v53  ;;  %v2304_v58 = vpack.c.bf16 %v258_v57, %v257_v56  ;;  %v2019_v57 = vld [vmem:[%s2480_s3] sm:$0xff]  }
  0x17   : > { %1613 = vmatpush3.bf16.msra.mxu0 %v1991_v8  ;;  %1875 = vmatpush3.bf16.msra.mxu1 %v2191_v27 }
  0x18   : > { %1614 = vmatprep.subr.bf16.mxu0 %v2047_v1  ;;  %1876 = vmatprep.subr.bf16.mxu1 %v2049_v3  ;;  %v267_v34 = vld [vmem:[#allocation2 + $0x8] sm:$0xff] }
  0x19   : > { %v266_v33 = vld [vmem:[#allocation2] sm:$0xff]  ;;  %v484_v45 = vld [vmem:[#allocation2 + $0xa] sm:$0xff] }
  0x1a   : > { %v268_v35 = vpack.c.bf16 %v267_v34, %v266_v33  ;;  %v483_v44 = vld [vmem:[#allocation2 + $0x2] sm:$0xff]  ;;  %v2013_v33 = vld [vmem:[%s2480_s3 + $0x50] sm:$0xff]   ;;  %v2014_v34 = vld [vmem:[%s2480_s3 + $0x58] sm:$0xff]  }
  0x1b   : > { %1615 = vmatpush3.bf16.msra.mxu0 %v1992_v9  ;;  %v485_v46 = vpack.c.bf16 %v484_v45, %v483_v44  ;;  %1878 = vmatpush3.bf16.msra.mxu1 %v2268_v49 }
  0x1c   : > { %1616 = vmatprep.subr.bf16.mxu0 %v2047_v1  ;;  %1879 = vmatprep.subr.bf16.mxu1 %v2049_v3 }
  0x1f   : > { %1617 = vmatpush3.bf16.msra.mxu0 %v1993_v10  ;;  %1881 = vmatpush3.bf16.msra.mxu1 %v2280_v52  ;;  %v671_v10 = vlaneseq }
  0x20   : > { %1618 = vmatprep.subr.bf16.mxu0 %v2047_v1  ;;  %1882 = vmatprep.subr.bf16.mxu1 %v2049_v3 }
  0x23   : > { %1619 = vmatpush3.bf16.msra.mxu0 %v1994_v11  ;;  %1884 = vmatpush3.bf16.msra.mxu1 %v2292_v55  ;;  %v2328_v11 = vshrl.u32 %v671_v10, 7 }
  0x24   : > { %1624 = vmatprep.subr.bf16.mxu0 %v2047_v1  ;;  %1885 = vmatprep.subr.bf16.mxu1 %v2049_v3 }
  0x25   : > { %v2331_v12 = vsub.s32 0, %v2328_v11 }
  0x26   : > { %1621 = vmatmul.mubr.bf16.vlgmr.msra.gmra.mrb[0].mxu0 %v287_v20 }
  0x27   : > { %1625 = vmatpush3.bf16.msra.mxu0 %v1995_v17  ;;  %1640 = vmatprep.mubr.msk.bf16.mxu0 %vm2048_vm0, %v2047_v1 }
  0x28   : > { %1626 = vmatprep.subr.bf16.mxu0 %v2047_v1  ;;  %1887 = vmatpush3.bf16.msra.mxu1 %v2304_v58 }
  0x29   : > { %1888 = vmatprep.subr.bf16.mxu1 %v2049_v3 }
  0x2b   : > { %1627 = vmatpush3.bf16.msra.mxu0 %v1996_v22 }
  0x2c   : > { %1628 = vmatprep.subr.bf16.mxu0 %v2047_v1 }
  0x2f   : > { %1629 = vmatpush3.bf16.msra.mxu0 %v1997_v26 }
  0x30   : > { %1630 = vmatprep.subr.bf16.mxu0 %v2047_v1 }
  0x33   : > { %1631 = vmatpush3.bf16.msra.mxu0 %v1998_v28 }
  0x34   : > { %1632 = vmatprep.subr.bf16.mxu0 %v2047_v1 }
  0x37   : > { %1633 = vmatpush3.bf16.msra.mxu0 %v1999_v29 }
  0x38   : > { %1634 = vmatprep.subr.bf16.mxu0 %v2047_v1 }
  0x3b   : > { %1635 = vmatpush3.bf16.msra.mxu0 %v2000_v30 }
  0x3c   : > { %1636 = vmatprep.subr.bf16.mxu0 %v2047_v1 }
  0x3f   : > { %1637 = vmatpush3.bf16.msra.mxu0 %v2001_v31  ;;  %v2011_v31 = vld [vmem:[%s2480_s3 + $0x40] sm:$0xff]  }
  0x40   : > { %1638 = vmatprep.subr.bf16.mxu0 %v2047_v1 }
  0x43   : > { %1639 = vmatpush3.bf16.msra.mxu0 %v2002_v32  ;;  %v2012_v32 = vld [vmem:[%s2480_s3 + $0x48] sm:$0xff]  }
  0x44   : > { %1644 = vmatprep.subr.bf16.mxu0 %v2047_v1 }
  0x46   : > { %1641 = vmatmul.mubr.bf16.vlgmr.msra.gmra.mrb[0].mxu0 %v268_v35  ;;  %v2015_v35 = vld [vmem:[%s2480_s3 + $0x60] sm:$0xff]  }
  0x47   : > { %1645 = vmatpush3.bf16.msra.mxu0 %v2003_v36  ;;  %1660 = vmatprep.mubr.msk.bf16.mxu0 %vm2048_vm0, %v2047_v1  ;;  %v2016_v36 = vld [vmem:[%s2480_s3 + $0x68] sm:$0xff]  }
  0x48   : > { %1646 = vmatprep.subr.bf16.mxu0 %v2047_v1 }
  0x4b   : > { %1647 = vmatpush3.bf16.msra.mxu0 %v2004_v37  ;;  %v2017_v37 = vld [vmem:[%s2480_s3 + $0x70] sm:$0xff]  }
  0x4c   : > { %1648 = vmatprep.subr.bf16.mxu0 %v2047_v1 }
  0x4f   : > { %1649 = vmatpush3.bf16.msra.mxu0 %v2005_v38  ;;  %v2018_v38 = vld [vmem:[%s2480_s3 + $0x78] sm:$0xff]  }
  0x50   : > { %1650 = vmatprep.subr.bf16.mxu0 %v2047_v1 }
  0x53   : > { %1651 = vmatpush3.bf16.msra.mxu0 %v2006_v39 }
  0x54   : > { %1652 = vmatprep.subr.bf16.mxu0 %v2047_v1 }
  0x57   : > { %1653 = vmatpush3.bf16.msra.mxu0 %v2007_v40 }
  0x58   : > { %1654 = vmatprep.subr.bf16.mxu0 %v2047_v1 }
  0x5b   : > { %1655 = vmatpush3.bf16.msra.mxu0 %v2008_v41 }
  0x5c   : > { %1656 = vmatprep.subr.bf16.mxu0 %v2047_v1 }
  0x5f   : > { %1657 = vmatpush3.bf16.msra.mxu0 %v2009_v42  ;;  %v2372_v42 = vld [vmem:[%s236_s10] sm:$0xf] }
  0x60   : > { %1658 = vmatprep.subr.bf16.mxu0 %v2047_v1 }
  0x63   : > { %1659 = vmatpush3.bf16.msra.mxu0 %v2010_v43  ;;  %v766_v43 = vsub.s32 1, %v2328_v11 }
  0x64   : > { %1912 = vmatprep.subr.bf16.mxu0 %v2049_v3 }
  0x65   : > { %v767_v47 = vrot.slane %v2372_v42, %v766_v43 }
  0x66   : > { %1661 = vmatmul.mubr.bf16.vlgmr.msra.gmra.mrb[0].mxu0 %v485_v46 }
  0x67   : > { %1914 = vmatpush3.bf16.msra.mxu0 %v2150_v15  ;;  %1826 = vmatprep.mubr.msk.f32.mxu0 %vm2048_vm0, %v2047_v1 }
  0x68   : > { %1915 = vmatprep.subr.bf16.mxu0 %v2049_v3 }
  0x6b   : > { %1917 = vmatpush3.bf16.msra.mxu0 %v2167_v21 }
  0x6c   : > { %1918 = vmatprep.subr.bf16.mxu0 %v2049_v3 }
  0x6f   : > { %1920 = vmatpush3.bf16.msra.mxu0 %v2181_v25 }
  0x70   : > { %1921 = vmatprep.subr.bf16.mxu0 %v2049_v3 }
  0x73   : > { %1923 = vmatpush3.bf16.msra.mxu0 %v2191_v27 }
  0x74   : > { %1924 = vmatprep.subr.bf16.mxu0 %v2049_v3 }
  0x77   : > { %1926 = vmatpush3.bf16.msra.mxu0 %v2268_v49 }
  0x78   : > { %1927 = vmatprep.subr.bf16.mxu0 %v2049_v3 }
  0x7b   : > { %1929 = vmatpush3.bf16.msra.mxu0 %v2280_v52 }
  0x7c   : > { %1930 = vmatprep.subr.bf16.mxu0 %v2049_v3 }
  0x7f   : > { %1932 = vmatpush3.bf16.msra.mxu0 %v2292_v55 }
  0x80   : > { %1933 = vmatprep.subr.bf16.mxu0 %v2049_v3 }
  0x83   : > { %1935 = vmatpush3.bf16.msra.mxu0 %v2304_v58 }
  0x84   : > { %1936 = vmatprep.subr.bf16.mxu0 %v2049_v3 }
 0x139   : > { %v585_v59 = vpop.f32.mrb[0].mxu0 }
 0x13a   : > { %v1662_v60 = vpop.f32.mrb[1].mxu0 }
 0x13b   : > { %v588_v61 = vpop.f32.mrb[2].mxu0  ;;  %v2020_v60 = vld [vmem:[%s2480_s3 + $0x8] sm:$0xff]  }
 0x13c   : > { %v594_v62 = vadd.f32 %v588_v61, %v585_v59  ;;  %v1663_v63 = vpop.f32.mrb[3].mxu0 }
 0x13d   : > { %v2023_v63 = vld [vmem:[%s2480_s3 + $0x20] sm:$0xff]  }
 0x13e   : > { %v595_v0 = vrot.slane %v594_v62, 4 }
 0x140   : > { %v596_v2 = vadd.f32 %v595_v0, %v594_v62  ;;  %v2022_v62 = vld [vmem:[%s2480_s3 + $0x18] sm:$0xff]   ;;  %v2024_v0 = vld [vmem:[%s2480_s3 + $0x28] sm:$0xff]  }
 0x142   : > { %v597_v4 = vrot.slane %v596_v2, 2 }
 0x144   : > { %v598_v7 = vadd.f32 %v597_v4, %v596_v2  ;;  %v2025_v2 = vld [vmem:[%s2480_s3 + $0x30] sm:$0xff]   ;;  %v2026_v4 = vld [vmem:[%s2480_s3 + $0x38] sm:$0xff]  }
 0x146   : > { %v599_v8 = vrot.slane %v598_v7, 1 }
 0x148   : > { %v600_v9 = vadd.f32 %v599_v8, %v598_v7 }
 0x14a   : > { %1697 = vmatmul.mubr.f32.vlgmr.msra.gmra.mrb[0].mxu1 %v600_v9  ;;  %v2027_v9 = vld [vmem:[%s2480_s3 + $0x80] sm:$0xff]  }
 0x14b   : > { %1890 = vmatpush3.bf16.msra.mxu1 %v2150_v15  ;;  %1731 = vmatprep.mubr.msk.f32.mxu1 %vm2048_vm0, %v2047_v1 }
 0x14c   : > { %1891 = vmatprep.subr.bf16.mxu1 %v2049_v3 }
 0x14f   : > { %1893 = vmatpush3.bf16.msra.mxu1 %v2167_v21 }
 0x150   : > { %1894 = vmatprep.subr.bf16.mxu1 %v2049_v3 }
 0x153   : > { %1896 = vmatpush3.bf16.msra.mxu1 %v2181_v25 }
 0x154   : > { %1897 = vmatprep.subr.bf16.mxu1 %v2049_v3 }
 0x157   : > { %1899 = vmatpush3.bf16.msra.mxu1 %v2191_v27 }
 0x158   : > { %1900 = vmatprep.subr.bf16.mxu1 %v2049_v3 }
 0x15b   : > { %1902 = vmatpush3.bf16.msra.mxu1 %v2268_v49 }
 0x15c   : > { %1903 = vmatprep.subr.bf16.mxu1 %v2049_v3 }
 0x15f   : > { %1905 = vmatpush3.bf16.msra.mxu1 %v2280_v52 }
 0x160   : > { %1906 = vmatprep.subr.bf16.mxu1 %v2049_v3 }
 0x163   : > { %1908 = vmatpush3.bf16.msra.mxu1 %v2292_v55 }
 0x164   : > { %1909 = vmatprep.subr.bf16.mxu1 %v2049_v3 }
 0x167   : > { %1911 = vmatpush3.bf16.msra.mxu1 %v2304_v58 }
 0x168   : > { %1734 = vmatprep.subr.bf16.mxu1 %v2047_v1 }
 0x21d   : > { %v667_v13 = vpop.f32.mrb[0].mxu1 }
 0x21e   : > { %v674_v14 = vrot.slane %v667_v13, %v2331_v12  ;;  %v1698_v16 = vpop.f32.mrb[1].mxu1  ;;  %v2028_v13 = vld [vmem:[%s2480_s3 + $0x88] sm:$0xff]  }
 0x21f   : > { %v2030_v16 = vld [vmem:[%s2480_s3 + $0x98] sm:$0xff]  }
 0x220   : > { %v675_v17 = vsub.f32 %v585_v59, %v674_v14  ;;  %v676_v18 = vsub.f32 %v588_v61, %v674_v14  ;;  %v2021_v61 = vld [vmem:[%s2480_s3 + $0x10] sm:$0xff]  }
 0x221   : > { %v2029_v14 = vld [vmem:[%s2480_s3 + $0x90] sm:$0xff]  }
 0x222   : > { %v677_v19 = vmul.f32 %v675_v17, %v675_v17  ;;  %v678_v20 = vmul.f32 %v676_v18, %v676_v18 }
 0x224   : > { %v679_v22 = vadd.f32 %v678_v20, %v677_v19  ;;  %v2033_v19 = vld [vmem:[%s2480_s3 + $0xb0] sm:$0xff]   ;;  %v2034_v20 = vld [vmem:[%s2480_s3 + $0xb8] sm:$0xff]  }
 0x226   : > { %v680_v23 = vrot.slane %v679_v22, 4 }
 0x228   : > { %v681_v24 = vadd.f32 %v680_v23, %v679_v22 }
 0x22a   : > { %v682_v26 = vrot.slane %v681_v24, 2 }
 0x22c   : > { %v683_v28 = vadd.f32 %v682_v26, %v681_v24 }
 0x22e   : > { %v684_v29 = vrot.slane %v683_v28, 1 }
 0x230   : > { %v685_v30 = vadd.f32 %v684_v29, %v683_v28 }
 0x232   : > { %1732 = vmatmul.mubr.f32.vlgmr.msra.gmra.mrb[2].mxu1 %v685_v30 }
 0x233   : > { %1750 = vmatprep.mubr.msk.bf16.mxu1 %vm2048_vm0, %v2047_v1  ;;  %1735 = vmatpush3.bf16.msra.mxu1 %v2011_v31 }
 0x234   : > { %1736 = vmatprep.subr.bf16.mxu1 %v2047_v1 }
 0x237   : > { %1737 = vmatpush3.bf16.msra.mxu1 %v2012_v32 }
 0x238   : > { %1738 = vmatprep.subr.bf16.mxu1 %v2047_v1 }
 0x23b   : > { %1739 = vmatpush3.bf16.msra.mxu1 %v2013_v33 }
 0x23c   : > { %1740 = vmatprep.subr.bf16.mxu1 %v2047_v1 }
 0x23f   : > { %1741 = vmatpush3.bf16.msra.mxu1 %v2014_v34 }
 0x240   : > { %1742 = vmatprep.subr.bf16.mxu1 %v2047_v1 }
 0x243   : > { %1743 = vmatpush3.bf16.msra.mxu1 %v2015_v35 }
 0x244   : > { %1744 = vmatprep.subr.bf16.mxu1 %v2047_v1 }
 0x247   : > { %1745 = vmatpush3.bf16.msra.mxu1 %v2016_v36 }
 0x248   : > { %1746 = vmatprep.subr.bf16.mxu1 %v2047_v1 }
 0x24b   : > { %1747 = vmatpush3.bf16.msra.mxu1 %v2017_v37 }
 0x24c   : > { %1748 = vmatprep.subr.bf16.mxu1 %v2047_v1 }
 0x24f   : > { %1749 = vmatpush3.bf16.msra.mxu1 %v2018_v38 }
 0x250   : > { %1754 = vmatprep.subr.bf16.mxu1 %v2047_v1 }
 0x305   : > { %v752_v39 = vpop.f32.mrb[2].mxu1 }
 0x306   : > { %v753_v40 = vadd.f32 1e-08, %v752_v39  ;;  %v1733_v41 = vpop.f32.mrb[3].mxu1 }
 0x308   : > { %2035 = vrsqrt.f32 %v753_v40 }
 0x312   : > { %v2036_v44 = vpop.eup %2035 }
 0x313   : > { %v757_v45 = vmul.f32 %v2036_v44, %v2372_v42 }
 0x315   : > { %v761_v46 = vrot.slane %v757_v45, %v2331_v12 }
 0x317   : > { %v762_v48 = vmul.f32 %v761_v46, %v675_v17  ;;  %v763_v50 = vmul.f32 %v761_v46, %v676_v18  ;;  %v2031_v17 = vld [vmem:[%s2480_s3 + $0xa0] sm:$0xff]   ;;  %v2032_v18 = vld [vmem:[%s2480_s3 + $0xa8] sm:$0xff]   ;;  %v1268_v46 = vrot.slane %v2372_v42, 2 }
 0x319   : > { %v768_v51 = vadd.f32 %v767_v47, %v762_v48  ;;  %v769_v53 = vadd.f32 %v767_v47, %v763_v50  ;;  %v1279_v47 = vsub.s32 3, %v2328_v11 }
 0x31b   : > { %v770_v54 = vmax.f32 %v768_v51, 0.0  ;;  %v771_v56 = vmax.f32 %v769_v53, 0.0  ;;  %v1280_v53 = vrot.slane %v2372_v42, %v1279_v47 }
 0x31d   : > { %772 = vst [vmem:[#allocation2 + $0x1] sm:$0xff] %v770_v54  ;;  %773 = vst [vmem:[#allocation2 + $0x9] sm:$0xff] %v771_v56  ;;  %v797_v59 = vpack.c.bf16 %v771_v56, %v770_v54 }
 0x31e   : > { %774 = vst [vmem:[#allocation2 - $0x1] sm:$0x2] %v770_v54  ;;  %775 = vst [vmem:[#allocation2 + $0xb] sm:$0x40] %v771_v56 }
 0x31f   : > { %1751 = vmatmul.mubr.bf16.vlgmr.msra.gmra.mrb[4].mxu1 %v797_v59 }
 0x320   : > { %1755 = vmatpush3.bf16.msra.mxu1 %v2019_v57  ;;  %1770 = vmatprep.mubr.msk.bf16.mxu1 %vm2048_vm0, %v2047_v1 }
 0x321   : > { %1756 = vmatprep.subr.bf16.mxu1 %v2047_v1 }
 0x324   : > { %1757 = vmatpush3.bf16.msra.mxu1 %v2020_v60  ;;  %v777_v8 = vld [vmem:[#allocation2 + $0x8] sm:$0xff] }
 0x325   : > { %1758 = vmatprep.subr.bf16.mxu1 %v2047_v1  ;;  %v776_v7 = vld [vmem:[#allocation2] sm:$0xff]  ;;  %v994_v23 = vld [vmem:[#allocation2 + $0xa] sm:$0xff] }
 0x326   : > { %v778_v10 = vpack.c.bf16 %v777_v8, %v776_v7  ;;  %v993_v22 = vld [vmem:[#allocation2 + $0x2] sm:$0xff] }
 0x327   : > { %v995_v24 = vpack.c.bf16 %v994_v23, %v993_v22 }
 0x328   : > { %1759 = vmatpush3.bf16.msra.mxu1 %v2021_v61 }
 0x329   : > { %1760 = vmatprep.subr.bf16.mxu1 %v2047_v1 }
 0x32c   : > { %1761 = vmatpush3.bf16.msra.mxu1 %v2022_v62 }
 0x32d   : > { %1762 = vmatprep.subr.bf16.mxu1 %v2047_v1 }
 0x330   : > { %1763 = vmatpush3.bf16.msra.mxu1 %v2023_v63 }
 0x331   : > { %1764 = vmatprep.subr.bf16.mxu1 %v2047_v1 }
 0x334   : > { %1765 = vmatpush3.bf16.msra.mxu1 %v2024_v0 }
 0x335   : > { %1766 = vmatprep.subr.bf16.mxu1 %v2047_v1 }
 0x338   : > { %1767 = vmatpush3.bf16.msra.mxu1 %v2025_v2 }
 0x339   : > { %1768 = vmatprep.subr.bf16.mxu1 %v2047_v1 }
 0x33c   : > { %1769 = vmatpush3.bf16.msra.mxu1 %v2026_v4 }
 0x33d   : > { %1774 = vmatprep.subr.bf16.mxu1 %v2047_v1 }
 0x33f   : > { %1771 = vmatmul.mubr.bf16.vlgmr.msra.gmra.mrb[4].mxu1 %v778_v10 }
 0x340   : > { %1775 = vmatpush3.bf16.msra.mxu1 %v2027_v9  ;;  %1790 = vmatprep.mubr.msk.bf16.mxu1 %vm2048_vm0, %v2047_v1 }
 0x341   : > { %1776 = vmatprep.subr.bf16.mxu1 %v2047_v1 }
 0x344   : > { %1777 = vmatpush3.bf16.msra.mxu1 %v2028_v13 }
 0x345   : > { %1778 = vmatprep.subr.bf16.mxu1 %v2047_v1 }
 0x348   : > { %1779 = vmatpush3.bf16.msra.mxu1 %v2029_v14 }
 0x349   : > { %1780 = vmatprep.subr.bf16.mxu1 %v2047_v1 }
 0x34c   : > { %1781 = vmatpush3.bf16.msra.mxu1 %v2030_v16 }
 0x34d   : > { %1782 = vmatprep.subr.bf16.mxu1 %v2047_v1 }
 0x350   : > { %1783 = vmatpush3.bf16.msra.mxu1 %v2031_v17 }
 0x351   : > { %1784 = vmatprep.subr.bf16.mxu1 %v2047_v1 }
 0x354   : > { %1785 = vmatpush3.bf16.msra.mxu1 %v2032_v18 }
 0x355   : > { %1786 = vmatprep.subr.bf16.mxu1 %v2047_v1 }
 0x358   : > { %1787 = vmatpush3.bf16.msra.mxu1 %v2033_v19 }
 0x359   : > { %1788 = vmatprep.subr.bf16.mxu1 %v2047_v1 }
 0x35c   : > { %1789 = vmatpush3.bf16.msra.mxu1 %v2034_v20 }
 0x35f   : > { %1791 = vmatmul.mubr.bf16.vlgmr.msra.gmra.mrb[4].mxu1 %v995_v24 }
 0x432   : > { %v1095_v26 = vpop.f32.mrb[4].mxu1 }
 0x433   : > { %v1792_v28 = vpop.f32.mrb[5].mxu1 }
 0x434   : > { %v1098_v29 = vpop.f32.mrb[6].mxu1 }
 0x435   : > { %v1104_v30 = vadd.f32 %v1098_v29, %v1095_v26  ;;  %v1793_v31 = vpop.f32.mrb[7].mxu1 }
 0x437   : > { %v1105_v32 = vrot.slane %v1104_v30, 4 }
 0x439   : > { %v1106_v33 = vadd.f32 %v1105_v32, %v1104_v30 }
 0x43b   : > { %v1107_v34 = vrot.slane %v1106_v33, 2 }
 0x43d   : > { %v1108_v35 = vadd.f32 %v1107_v34, %v1106_v33 }
 0x43f   : > { %v1109_v36 = vrot.slane %v1108_v35, 1 }
 0x441   : > { %v1110_v37 = vadd.f32 %v1109_v36, %v1108_v35 }
 0x443   : > { %1827 = vmatmul.mubr.f32.vlgmr.msra.gmra.mrb[4].mxu0 %v1110_v37 }
 0x444   : > { %1938 = vmatpush3.bf16.msra.mxu0 %v2150_v15  ;;  %1861 = vmatprep.mubr.msk.f32.mxu0 %vm2048_vm0, %v2047_v1 }
 0x445   : > { %1939 = vmatprep.subr.bf16.mxu0 %v2049_v3 }
 0x448   : > { %1941 = vmatpush3.bf16.msra.mxu0 %v2167_v21 }
 0x449   : > { %1942 = vmatprep.subr.bf16.mxu0 %v2049_v3 }
 0x44c   : > { %1944 = vmatpush3.bf16.msra.mxu0 %v2181_v25 }
 0x44d   : > { %1945 = vmatprep.subr.bf16.mxu0 %v2049_v3 }
 0x450   : > { %1947 = vmatpush3.bf16.msra.mxu0 %v2191_v27 }
 0x451   : > { %1948 = vmatprep.subr.bf16.mxu0 %v2049_v3 }
 0x454   : > { %1950 = vmatpush3.bf16.msra.mxu0 %v2268_v49 }
 0x455   : > { %1951 = vmatprep.subr.bf16.mxu0 %v2049_v3 }
 0x458   : > { %1953 = vmatpush3.bf16.msra.mxu0 %v2280_v52 }
 0x459   : > { %1954 = vmatprep.subr.bf16.mxu0 %v2049_v3 }
 0x45c   : > { %1956 = vmatpush3.bf16.msra.mxu0 %v2292_v55 }
 0x45d   : > { %1957 = vmatprep.subr.bf16.mxu0 %v2049_v3 }
 0x460   : > { %1959 = vmatpush3.bf16.msra.mxu0 %v2304_v58 }
 0x516   : > { %v1177_v1 = vpop.f32.mrb[4].mxu0 }
 0x517   : > { %v1184_v15 = vrot.slane %v1177_v1, %v2331_v12  ;;  %v1828_v21 = vpop.f32.mrb[5].mxu0 }
 0x519   : > { %v1185_v25 = vsub.f32 %v1095_v26, %v1184_v15  ;;  %v1186_v27 = vsub.f32 %v1098_v29, %v1184_v15 }
 0x51b   : > { %v1187_v38 = vmul.f32 %v1185_v25, %v1185_v25  ;;  %v1188_v49 = vmul.f32 %v1186_v27, %v1186_v27 }
 0x51d   : > { %v1189_v39 = vadd.f32 %v1188_v49, %v1187_v38 }
 0x51f   : > { %v1190_v40 = vrot.slane %v1189_v39, 4 }
 0x521   : > { %v1191_v41 = vadd.f32 %v1190_v40, %v1189_v39 }
 0x523   : > { %v1192_v52 = vrot.slane %v1191_v41, 2 }
 0x525   : > { %v1193_v43 = vadd.f32 %v1192_v52, %v1191_v41 }
 0x527   : > { %v1194_v44 = vrot.slane %v1193_v43, 1 }
 0x529   : > { %v1195_v45 = vadd.f32 %v1194_v44, %v1193_v43 }
 0x52b   : > { %1862 = vmatmul.mubr.f32.vlgmr.msra.gmra.mrb[6].mxu0 %v1195_v45 }
 0x5fe   : > { %v1262_v3 = vpop.f32.mrb[6].mxu0 }
 0x5ff   : > { %v1263_v55 = vadd.f32 1e-08, %v1262_v3  ;;  %v1863_v58 = vpop.f32.mrb[7].mxu0 }
 0x601   : > { %2037 = vrsqrt.f32 %v1263_v55 }
 0x60b   : > { %v2038_v48 = vpop.eup %2037 }
 0x60c   : > { %v1270_v50 = vmul.f32 %v2038_v48, %v1268_v46 }
 0x60e   : > { %v1274_v51 = vrot.slane %v1270_v50, %v2331_v12 }
 0x610   : > { %v1275_v54 = vmul.f32 %v1274_v51, %v1185_v25  ;;  %v1276_v56 = vmul.f32 %v1274_v51, %v1186_v27 }
 0x612   : > { %v1281_v57 = vadd.f32 %v1280_v53, %v1275_v54  ;;  %v1282_v59 = vadd.f32 %v1280_v53, %v1276_v56 }
 0x614   : > { %v1285_v60 = vadd.f32 %v1281_v57, %v2113_v5  ;;  %v1286_v61 = vadd.f32 %v1282_v59, %v2115_v6 }
 0x616   : > { %1287 = vst [vmem:[%s241_s25] sm:$0xff] %v1285_v60  ;;  %1288 = vst [vmem:[%s241_s25 + $0x8] sm:$0xff] %v1286_v61 }
 0x617 PF: > { %s15_s18 = sadd.s32 1, %s2045_s18  }
 0x618   : > { %p12_p4 = scmp.ge.s32.totalorder %s15_s18, 4  }
 0x61a   :  { %14 = sbr.rel (!%p12_p4) target bundleno = 1 (0x1), region = 77 }

</bundles_post_ra>
